<compile_context>
chip_gen: v5e
topology: v5e:2x2
jax: 0.10.0
libtpu: 0.0.40
codegen_flags: <defaults>
</compile_context>

<pallas_src>
import functools

import jax
import jax.numpy as jnp
from jax.experimental import pallas as pl
from jax.experimental.pallas import tpu as pltpu


def _chip_defaults():
    """Generation-aware VMEM budget / scoped limit / TensorCore count."""
    kind = ""
    try:
        kind = jax.devices()[0].device_kind.lower()
    except Exception:
        pass
    if "v7" in kind:
        # v7x: 64 MiB VMEM per TensorCore, 2 TensorCores per chip.
        return {"budget": 20 << 20, "vmem_limit": 32 << 20, "num_cores": 2}
    if "v5" in kind or "v6" in kind:
        # v5e / v6e: 128 MiB physical VMEM, single TensorCore.
        return {"budget": 44 << 20, "vmem_limit": 64 << 20, "num_cores": 1}
    # Unknown generation: conservative settings that are valid everywhere.
    return {"budget": 20 << 20, "vmem_limit": 32 << 20, "num_cores": 1}


def _auto_tile_n(n, c, in_bytes_per_elem, budget):
    """Largest row tile keeping double-buffered inputs plus ~8 f32-tile-sized
    temporaries under `budget` bytes of VMEM, capped at 8192 rows."""
    per_row = c * (2 * in_bytes_per_elem + 8 * 4)
    t = budget // max(per_row, 1)
    t = int(max(8, min(t, 8192)))
    t = (t // 8) * 8
    if n >= 8:
        t = min(t, (n // 8) * 8)   # never exceed the (rounded-down) row count
    return max(t, 8)


def _balanced_bce_kernel(logits_ref, labels_ref, out_ref, *,
                         n_rows, tile_n, steps_per_split, apply_mask,
                         grad_clip):
    p = pl.program_id(0)   # parallel split (megacore on v7x)
    j = pl.program_id(1)   # reduction steps within the split

    # Output block (1, 8, C) is resident across the reduction axis -> use it
    # as the accumulator; zero it at the start of each split.
    @pl.when(j == 0)
    def _():
        out_ref[...] = jnp.zeros_like(out_ref)

    x = logits_ref[...].astype(jnp.float32)
    y = labels_ref[...].astype(jnp.float32)

    if grad_clip:  # module default is False; kept for parity with the spec
        x = jnp.clip(x, -14.0, 14.0)

    c = y.shape[-1]
    nc = jnp.float32(c)

    # alpha = (nc - npos) / npos, with npos == 0 -> alpha = 0 (the Inf case).
    # Only alpha - 1 is needed per row (for valid rows with npos == 0, y == 0
    # everywhere so the value is irrelevant anyway).
    npos = jnp.sum(y, axis=-1, keepdims=True)                      # (tile_n, 1)
    safe_npos = jnp.where(npos == 0.0, 1.0, npos)
    alpha_m1 = jnp.where(npos == 0.0, -1.0, (nc - npos) / safe_npos - 1.0)

    # Stable BCE-with-logits:
    #   -(log(sigmoid(x)) * y*alpha + log(1 - sigmoid(x)) * (1 - y))
    #     = (1 + y*(alpha-1)) * softplus(-x) + (1 - y) * x
    # softplus(-x) = max(-x, 0) + log(1 + exp(-|x|))   (one exp + one log)
    w = 1.0 + y * alpha_m1
    neg = 1.0 - y
    sp_negx = jnp.maximum(-x, 0.0) + jnp.log(1.0 + jnp.exp(-jnp.abs(x)))
    loss = w * sp_negx + neg * x                                   # (tile_n, C)

    def _accumulate(l):
        # Sublane-aligned fold (tile_n, C) -> (8, C): VALU adds only, no XLU
        # cross-sublane reduce and no masked sublane-1 stores.
        partial = jnp.sum(l.reshape(tile_n // 8, 8, c), axis=0)    # (8, C)
        out_ref[...] += partial[None]                              # (1, 8, C)

    if apply_mask:
        row0 = (p * steps_per_split + j) * tile_n
        is_edge = row0 + tile_n > n_rows    # ragged tail or clamped dup step

        @pl.when(is_edge)
        def _():
            rows = row0 + jax.lax.broadcasted_iota(jnp.int32, (tile_n, 1), 0)
            # Keep this a select: OOB rows may hold garbage/NaN.
            _accumulate(jnp.where(rows < n_rows, loss, 0.0))

        @pl.when(jnp.logical_not(is_edge))
        def _():
            _accumulate(loss)
    else:
        _accumulate(loss)


def balanced_bce_with_logits_loss(logits, labels, *, tile_n=None,
                                  num_parallel=None, grad_clip=False,
                                  cast_labels=True):
    """Pallas TPU implementation of BalancedBCEWithLogitsLoss (mean reduction)."""
    assert logits.shape == labels.shape, (logits.shape, labels.shape)
    n, c = logits.shape

    cfg = _chip_defaults()

    # Shrink HBM traffic: {0,1} labels are exact in bf16.  Set cast_labels=False
    # if labels can carry fractional values that need full f32 precision.
    if cast_labels and labels.dtype in (jnp.float32, jnp.float64):
        labels = labels.astype(jnp.bfloat16)

    in_bytes = (jnp.dtype(logits.dtype).itemsize +
                jnp.dtype(labels.dtype).itemsize)
    if tile_n is None:
        tile_n = _auto_tile_n(n, c, in_bytes, cfg["budget"])
    tile_n = max(8, (int(tile_n) // 8) * 8)

    total_steps = pl.cdiv(n, tile_n)
    if num_parallel is None:
        num_parallel = cfg["num_cores"]
    num_splits = max(1, min(int(num_parallel), total_steps))
    steps_per_split = pl.cdiv(total_steps, num_splits)
    # Mask needed if the last block is ragged or some steps are clamped dups.
    apply_mask = (total_steps * tile_n != n) or \
                 (num_splits * steps_per_split != total_steps)

    kernel = functools.partial(
        _balanced_bce_kernel,
        n_rows=n, tile_n=tile_n, steps_per_split=steps_per_split,
        apply_mask=apply_mask, grad_clip=grad_clip)

    def in_index_map(p, j):
        i = p * steps_per_split + j
        i = jnp.minimum(i, total_steps - 1)   # clamp dup steps; masked in-kernel
        return (i, 0)

    partial_sums = pl.pallas_call(
        kernel,
        out_shape=jax.ShapeDtypeStruct((num_splits, 8, c), jnp.float32),
        grid_spec=pltpu.PrefetchScalarGridSpec(
            num_scalar_prefetch=0,
            grid=(num_splits, steps_per_split),
            in_specs=[
                pl.BlockSpec((tile_n, c), in_index_map),
                pl.BlockSpec((tile_n, c), in_index_map),
            ],
            out_specs=pl.BlockSpec((1, 8, c), lambda p, j: (p, 0, 0)),
        ),
        compiler_params=pltpu.CompilerParams(
            dimension_semantics=("parallel", "arbitrary"),
            vmem_limit_bytes=cfg["vmem_limit"],
        ),
    )(logits, labels)

    # Tiny final reduction + mean in plain JAX.
    return jnp.sum(partial_sums) / jnp.float32(n * c)


def _reference(logits, labels):
    """Pure-JAX reference mirroring the PyTorch forward (grad_clip=False)."""
    nc = labels.shape[1]
    npos = labels.sum(axis=1)
    alpha = (nc - npos) / npos
    alpha = jnp.where(jnp.isinf(alpha), 0.0, alpha)[:, None]
    pos_weight = labels * alpha
    proba = jax.nn.sigmoid(logits)
    loss = -(jnp.log(proba) * pos_weight + jnp.log(1.0 - proba) * (1.0 - labels))
    return loss.mean()


if __name__ == "__main__":
    key = jax.random.PRNGKey(0)

    def run_case(n, c, case_key):
        k1, k2 = jax.random.split(case_key)
        logits = jax.random.normal(k1, (n, c), dtype=jnp.float32) * 3.0
        labels = (jax.random.uniform(k2, (n, c)) < 0.25).astype(jnp.float32)
        # One all-negative example to exercise the alpha == inf -> 0 path.
        labels = labels.at[3, :].set(0.0)
        out = balanced_bce_with_logits_loss(logits, labels)
        jax.block_until_ready(out)
        ref = _reference(logits, labels)
        assert abs(float(out) - float(ref)) < 1e-4 * max(1.0, abs(float(ref))), (
            n, c, float(out), float(ref))

    run_case(16, 128, jax.random.fold_in(key, 0))   # divisible rows, single step
    run_case(20, 128, jax.random.fold_in(key, 1))   # ragged rows -> masked edge step
    print("KERNEL_OK")
</pallas_src>

<mosaic_0001>
module attributes {stable_mosaic.version = 11 : i64} {
  func.func @_balanced_bce_kernel(%arg0: i32, %arg1: i32, %arg2: memref<16x128xf32, #tpu.memory_space<vmem>>, %arg3: memref<16x128xbf16, #tpu.memory_space<vmem>>, %arg4: memref<1x8x128xf32, #tpu.memory_space<vmem>>) attributes {dimension_semantics = [#tpu.dimension_semantics<parallel>, #tpu.dimension_semantics<arbitrary>], iteration_bounds = array<i64: 1, 1>, scalar_prefetch = 0 : i64, scratch_operands = 0 : i64, tpu.core_type = #tpu.core_type<tc>, window_params = [{transform_indices = @transform_0, window_bounds = array<i64: 16, 128>}, {transform_indices = @transform_1, window_bounds = array<i64: 16, 128>}, {transform_indices = @transform_2, window_bounds = array<i64: 1, 8, 128>}]} {
    %c0_i32 = arith.constant 0 : i32
    %0 = arith.cmpi eq, %arg1, %c0_i32 : i32
    %1 = arith.extui %0 : i1 to i32
    %c0_i32_0 = arith.constant 0 : i32
    %2 = arith.cmpi ne, %1, %c0_i32_0 : i32
    scf.if %2 {
      %cst_23 = arith.constant 0.000000e+00 : f32
      %48 = vector.broadcast %cst_23 : f32 to vector<1x8x128xf32>
      %c0_24 = arith.constant 0 : index
      %c0_25 = arith.constant 0 : index
      %c0_26 = arith.constant 0 : index
      %49 = vector.load %arg4[%c0_24, %c0_25, %c0_26] : memref<1x8x128xf32, #tpu.memory_space<vmem>>, vector<1x8x128xf32>
      tpu.vector_store %arg4[%c0_24, %c0_25, %c0_26], %48 {strides = array<i32>} : memref<1x8x128xf32, #tpu.memory_space<vmem>>, vector<1x8x128xf32>,
    } else {
    }
    %c0 = arith.constant 0 : index
    %c0_1 = arith.constant 0 : index
    %3 = vector.load %arg2[%c0, %c0_1] : memref<16x128xf32, #tpu.memory_space<vmem>>, vector<16x128xf32>
    %c0_2 = arith.constant 0 : index
    %c0_3 = arith.constant 0 : index
    %4 = vector.load %arg3[%c0_2, %c0_3] : memref<16x128xbf16, #tpu.memory_space<vmem>>, vector<16x128xbf16>
    %5 = arith.extf %4 : vector<16x128xbf16> to vector<16x128xf32>
    %cst = arith.constant dense<0.000000e+00> : vector<16xf32>
    %6 = vector.multi_reduction <add>, %5, %cst [1] : vector<16x128xf32> to vector<16xf32>
    %7 = vector.shape_cast %6 : vector<16xf32> to vector<16x1xf32>
    %cst_4 = arith.constant 0.000000e+00 : f32
    %8 = vector.broadcast %cst_4 : f32 to vector<16x1xf32>
    %9 = arith.cmpf oeq, %7, %8 : vector<16x1xf32>
    %cst_5 = arith.constant 1.000000e+00 : f32
    %10 = vector.broadcast %cst_5 : f32 to vector<16x1xf32>
    %11 = arith.select %9, %10, %7 : vector<16x1xi1>, vector<16x1xf32>
    %cst_6 = arith.constant 0.000000e+00 : f32
    %12 = vector.broadcast %cst_6 : f32 to vector<16x1xf32>
    %13 = arith.cmpf oeq, %7, %12 : vector<16x1xf32>
    %cst_7 = arith.constant 1.280000e+02 : f32
    %14 = vector.broadcast %cst_7 : f32 to vector<16x1xf32>
    %15 = arith.subf %14, %7 : vector<16x1xf32>
    %16 = arith.divf %15, %11 : vector<16x1xf32>
    %cst_8 = arith.constant 1.000000e+00 : f32
    %17 = vector.broadcast %cst_8 : f32 to vector<16x1xf32>
    %18 = arith.subf %16, %17 : vector<16x1xf32>
    %cst_9 = arith.constant -1.000000e+00 : f32
    %19 = vector.broadcast %cst_9 : f32 to vector<16x1xf32>
    %20 = arith.select %13, %19, %18 : vector<16x1xi1>, vector<16x1xf32>
    %21 = vector.broadcast %20 : vector<16x1xf32> to vector<16x128xf32>
    %22 = arith.mulf %5, %21 : vector<16x128xf32>
    %cst_10 = arith.constant 1.000000e+00 : f32
    %23 = vector.broadcast %cst_10 : f32 to vector<16x128xf32>
    %24 = arith.addf %23, %22 : vector<16x128xf32>
    %cst_11 = arith.constant 1.000000e+00 : f32
    %25 = vector.broadcast %cst_11 : f32 to vector<16x128xf32>
    %26 = arith.subf %25, %5 : vector<16x128xf32>
    %cst_12 = arith.constant 0.000000e+00 : f32
    %27 = vector.broadcast %cst_12 : f32 to vector<16x128xf32>
    %28 = arith.subf %27, %3 : vector<16x128xf32>
    %cst_13 = arith.constant 0.000000e+00 : f32
    %29 = vector.broadcast %cst_13 : f32 to vector<16x128xf32>
    %30 = arith.maximumf %28, %29 : vector<16x128xf32>
    %31 = math.absf %3 : vector<16x128xf32>
    %cst_14 = arith.constant 0.000000e+00 : f32
    %32 = vector.broadcast %cst_14 : f32 to vector<16x128xf32>
    %33 = arith.subf %32, %31 : vector<16x128xf32>
    %34 = math.exp %33 : vector<16x128xf32>
    %cst_15 = arith.constant 1.000000e+00 : f32
    %35 = vector.broadcast %cst_15 : f32 to vector<16x128xf32>
    %36 = arith.addf %35, %34 : vector<16x128xf32>
    %37 = math.log %36 : vector<16x128xf32>
    %38 = arith.addf %30, %37 : vector<16x128xf32>
    %39 = arith.mulf %24, %38 : vector<16x128xf32>
    %40 = arith.mulf %26, %3 : vector<16x128xf32>
    %41 = arith.addf %39, %40 : vector<16x128xf32>
    %42 = vector.shape_cast %41 : vector<16x128xf32> to vector<2x8x128xf32>
    %cst_16 = arith.constant dense<0.000000e+00> : vector<8x128xf32>
    %43 = vector.multi_reduction <add>, %42, %cst_16 [0] : vector<2x8x128xf32> to vector<8x128xf32>
    %c0_17 = arith.constant 0 : index
    %c0_18 = arith.constant 0 : index
    %c0_19 = arith.constant 0 : index
    %44 = vector.load %arg4[%c0_17, %c0_18, %c0_19] : memref<1x8x128xf32, #tpu.memory_space<vmem>>, vector<1x8x128xf32>
    %45 = vector.shape_cast %43 : vector<8x128xf32> to vector<1x8x128xf32>
    %46 = arith.addf %44, %45 : vector<1x8x128xf32>
    %c0_20 = arith.constant 0 : index
    %c0_21 = arith.constant 0 : index
    %c0_22 = arith.constant 0 : index
    %47 = vector.load %arg4[%c0_20, %c0_21, %c0_22] : memref<1x8x128xf32, #tpu.memory_space<vmem>>, vector<1x8x128xf32>
    tpu.vector_store %arg4[%c0_20, %c0_21, %c0_22], %46 {strides = array<i32>} : memref<1x8x128xf32, #tpu.memory_space<vmem>>, vector<1x8x128xf32>,
    return
  }
  func.func @transform_0(%arg0: i32, %arg1: i32) -> (i32, i32) {
    %c1_i32 = arith.constant 1 : i32
    %0 = arith.muli %arg0, %c1_i32 : i32
    %1 = arith.addi %0, %arg1 : i32
    %c0_i32 = arith.constant 0 : i32
    %2 = arith.minsi %1, %c0_i32 : i32
    %c0_i32_0 = arith.constant 0 : i32
    %c0_i32_1 = arith.constant 0 : i32
    return %2, %c0_i32_0 : i32, i32
  }
  func.func @transform_1(%arg0: i32, %arg1: i32) -> (i32, i32) {
    %c1_i32 = arith.constant 1 : i32
    %0 = arith.muli %arg0, %c1_i32 : i32
    %1 = arith.addi %0, %arg1 : i32
    %c0_i32 = arith.constant 0 : i32
    %2 = arith.minsi %1, %c0_i32 : i32
    %c0_i32_0 = arith.constant 0 : i32
    %c0_i32_1 = arith.constant 0 : i32
    return %2, %c0_i32_0 : i32, i32
  }
  func.func @transform_2(%arg0: i32, %arg1: i32) -> (i32, i32, i32) {
    %c0_i32 = arith.constant 0 : i32
    %c0_i32_0 = arith.constant 0 : i32
    %c0_i32_1 = arith.constant 0 : i32
    return %arg0, %c0_i32, %c0_i32_0 : i32, i32, i32
  }
}

</mosaic_0001>

<bundles_post_ra>
// kernel: tpu_custom_call.1
= control target key start
LH: loop header
LB: loop body
LE: loop exit
PB: predicated region body
PF: predicated region fallthrough
CT: control target
= control target key end

     0   :  { %7 = vsyncpa [#allocation3], 0  ;;  %s336_s0 = inlined_call_operand.hbm [shape: f32[16,128], index: 0, kind: input, shape index: {}]   ;;  %s337_s1 = inlined_call_operand.hbm [shape: bf16[16,128], index: 1, kind: input, shape index: {}]   ;;  %s338_s2 = inlined_call_operand.hbm [shape: f32[1,8,128], index: 2, kind: output, shape index: {}]  }
   0x1   :  { %8 = vsyncpa [#allocation6], 0 }
   0x2   :  { %9 = vsyncpa [#allocation4], 0  ;;  %s20_s11 = sshll.u32 %s336_s0, 4  ;;  %s281_s12 = smov [#allocation2]   ;;  %s21_s11 = int_to_ptr.hbm [resolvable:$true] %s20_s11 }
   0x3   :  { %s22_s13 = sshll.u32 %s281_s12, 4  ;;  %s39_s16 = sshll.u32 %s337_s1, 4  ;;  %s23_s13 = int_to_ptr.vmem [resolvable:$true] %s22_s13  ;;  %s40_s16 = int_to_ptr.hbm [resolvable:$true] %s39_s16 }
   0x4   :  { %s282_s17 = smov 128   ;;  %s283_s18 = smov 8  }
   0x5   :  { %28 = dma.hbm_to_vmem [thread:$0]  %s21_s11, 256, %s23_s13, [#allocation3], %s282_s17, %s282_s17, %s283_s18  }
   0x6   :  { %s284_s19 = smov [#allocation5]   ;;  %s285_s21 = smov 64  }
   0x7   :  { %s41_s20 = sshll.u32 %s284_s19, 4  ;;  %s286_s22 = smov 4   ;;  %s42_s20 = int_to_ptr.vmem [resolvable:$true] %s41_s20 }
   0x8   :  { %47 = dma.hbm_to_vmem [thread:$0]  %s40_s16, 128, %s42_s20, [#allocation6], %s285_s21, %s285_s21, %s286_s22  }
   0x9   :  { %275 = dma.done.wait [#allocation3], 256  }
   0xa   :  { %276 = vsyncadd [#allocation3], 4294967040 }
   0xb   :  { %277 = dma.done.wait [#allocation6], 128  }
   0xc   :  { %278 = vsyncadd [#allocation6], 4294967168  ;;  %v180_v0 = vld [vmem:[#allocation5] sm:$0xff]   ;;  %v315_v3 = vld [vmem:[#allocation2] sm:$0xff]  ;;  %s287_s0 = smov [#allocation7]   ;;  %s162_s25 = sshll.u32 %s338_s2, 4  ;;  %s163_s25 = int_to_ptr.hbm [resolvable:$true] %s162_s25 }
   0xd   :  { %v309_v1 = vunpack.c.l.bf16 %v180_v0  ;;  %v312_v2 = vunpack.c.h.bf16 %v180_v0  ;;  %v129_v4 = vand.u32 2147483647, %v315_v3  ;;  %v318_v5 = vld [vmem:[#allocation2 + $0x8] sm:$0xff]  ;;  %v125_v39 = vsub.f32 0.0, %v315_v3  ;;  %s160_s1 = sshll.u32 %s287_s0, 4  ;;  %s161_s1 = int_to_ptr.vmem [resolvable:$true] %s160_s1 }
   0xe   :  { %v130_v6 = vand.u32 2147483647, %v318_v5  ;;  %v126_v43 = vsub.f32 0.0, %v318_v5 }
   0xf   :  { %75 = vadd.xlane.f32.xlu0 %v309_v1  ;;  %v131_v7 = vsub.f32 0.0, %v129_v4  ;;  %v127_v48 = vmax.f32 %v125_v39, 0.0  ;;  %v123_v55 = vsub.f32 1.0, %v309_v1  ;;  %v124_v56 = vsub.f32 1.0, %v312_v2 }
  0x10   :  { %v132_v8 = vsub.f32 0.0, %v130_v6  ;;  %v128_v52 = vmax.f32 %v126_v43, 0.0 }
  0x11   :  { %v133_v9 = vmul.f32 1.442695, %v131_v7  ;;  %v147_v62 = vmul.f32 %v123_v55, %v315_v3  ;;  %v148_v4 = vmul.f32 %v124_v56, %v318_v5 }
  0x12   :  { %v135_v12 = vmul.f32 1.442695, %v132_v8 }
  0x17   :  { %77 = vadd.xlane.f32.xlu0 %v312_v2 }
  0x82   :  { %v76_v10 = vpop.xlane.xlu0 %75 }
  0x83   :  { %vm79_vm0 = vcmp.eq.f32.partialorder %v76_v10, 0.0  ;;  %v83_v28 = vsub.f32 128.0, %v76_v10 }
  0x84   :  { %v81_v11 = vsel %vm79_vm0, 1.0, %v76_v10 }
  0x85   :  { %191 = vrcp.f32 %v81_v11  ;;  %v96_v20 = vand.u32 2147483648, %v81_v11  ;;  %v94_v23 = vand.u32 2147483647, %v81_v11  ;;  %vm90_vm3 = vweird.f32 %v81_v11 }
  0x86   :  { %193 = vpow2.f32 %v133_v9 }
  0x87   :  { %195 = vpow2.f32 %v135_v12  ;;  %v97_v27 = vor.u32 1.1754944e-38, %v96_v20  ;;  %vm95_vm5 = vcmp.eq.f32.partialorder %v94_v23, 8.507059e+37 }
  0x8a   :  { %v78_v13 = vpop.xlane.xlu0 %77 }
  0x8b   :  { %v192_v14 = vpop.eup %191  ;;  %vm80_vm1 = vcmp.eq.f32.partialorder %v78_v13, 0.0  ;;  %v84_v45 = vsub.f32 128.0, %v78_v13 }
  0x8c   :  { %v194_v15 = vpop.eup %193  ;;  %v86_v16 = vmul.f32 %v192_v14, %v81_v11  ;;  %v82_v17 = vsel %vm80_vm1, 1.0, %v78_v13  ;;  %vm91_vm2 = vweird.f32 %v192_v14 }
  0x8d   :  { %197 = vrcp.f32 %v82_v17  ;;  %v196_v19 = vpop.eup %195  ;;  %v137_v21 = vadd.f32 1.0, %v194_v15  ;;  %vm92_vm4 = vmor %vm90_vm3, %vm91_vm2  ;;  %v111_v34 = vand.u32 2147483648, %v82_v17  ;;  %v109_v37 = vand.u32 2147483647, %v82_v17 }
  0x8e   :  { %v87_v18 = vsub.f32 1.0, %v86_v16  ;;  %v138_v25 = vadd.f32 1.0, %v196_v19  ;;  %vm105_vm7 = vweird.f32 %v82_v17 }
  0x8f   :  { %199 = vlog2.f32 %v137_v21  ;;  %v112_v42 = vor.u32 1.1754944e-38, %v111_v34  ;;  %vm110_vm9 = vcmp.eq.f32.partialorder %v109_v37, 8.507059e+37 }
  0x90   :  { %v88_v22 = vmul.f32 %v192_v14, %v87_v18  ;;  %201 = vlog2.f32 %v138_v25 }
  0x92   :  { %v89_v24 = vadd.f32 %v192_v14, %v88_v22 }
  0x93   :  { %v198_v26 = vpop.eup %197 }
  0x94   :  { %v93_v29 = vsel %vm92_vm4, %v192_v14, %v89_v24  ;;  %v101_v30 = vmul.f32 %v198_v26, %v82_v17  ;;  %vm106_vm6 = vweird.f32 %v198_v26 }
  0x95   :  { %v98_v31 = vsel %vm95_vm5, %v97_v27, %v93_v29  ;;  %v200_v38 = vpop.eup %199  ;;  %vm107_vm8 = vmor %vm105_vm7, %vm106_vm6 }
  0x96   :  { %v99_v32 = vmul.f32 %v98_v31, %v83_v28  ;;  %v102_v33 = vsub.f32 1.0, %v101_v30  ;;  %v202_v44 = vpop.eup %201  ;;  %v140_v49 = vmul.f32 0.6931472, %v200_v38 }
  0x97   :  { %v142_v53 = vmul.f32 0.6931472, %v202_v44 }
  0x98   :  { %v177_v35 = vadd.f32 -1.0, %v99_v32  ;;  %v103_v36 = vmul.f32 %v198_v26, %v102_v33  ;;  %v143_v58 = vadd.f32 %v140_v49, %v127_v48 }
  0x99   :  { %v144_v61 = vadd.f32 %v142_v53, %v128_v52 }
  0x9a   :  { %v117_v40 = vsel %vm79_vm0, -1.0, %v177_v35  ;;  %v104_v41 = vadd.f32 %v198_v26, %v103_v36 }
  0x9b   :  { %v119_v47 = vmul.f32 %v309_v1, %v117_v40 }
  0x9c   :  { %v108_v46 = vsel %vm107_vm8, %v198_v26, %v104_v41 }
  0x9d   :  { %v113_v50 = vsel %vm110_vm9, %v112_v42, %v108_v46  ;;  %v121_v57 = vadd.f32 1.0, %v119_v47 }
  0x9e   :  { %v114_v51 = vmul.f32 %v113_v50, %v84_v45 }
  0x9f   :  { %v145_v63 = vmul.f32 %v143_v58, %v121_v57 }
  0xa0   :  { %v178_v54 = vadd.f32 -1.0, %v114_v51 }
  0xa1   :  { %v149_v7 = vadd.f32 %v147_v62, %v145_v63 }
  0xa2   :  { %v118_v59 = vsel %vm80_vm1, -1.0, %v178_v54 }
  0xa3   :  { %v120_v60 = vmul.f32 %v312_v2, %v118_v59 }
  0xa5   :  { %v122_v0 = vadd.f32 1.0, %v120_v60 }
  0xa7   :  { %v146_v6 = vmul.f32 %v144_v61, %v122_v0 }
  0xa9   :  { %v150_v8 = vadd.f32 %v148_v4, %v146_v6 }
  0xab   :  { %v151_v1 = vadd.f32 %v150_v8, %v149_v7 }
  0xad   :  { %154 = vst [vmem:[#allocation7] sm:$0xff] %v151_v1 }
  0xae   :  { %165 = dma.vmem_to_hbm [thread:$0]  %s161_s1, 128, %s163_s25, [#allocation4]  }
  0xaf   :  { %279 = dma.done.wait [#allocation4], 128  }
  0xb0   :  { %280 = vsyncadd [#allocation4], 4294967168 }
  0xb1   :  { %170 = vsyncpa [#allocation3], 1 }
  0xb2   :  { %171 = vsyncpa [#allocation6], 1 }
  0xb3   :  { %172 = vsyncpa [#allocation4], 1 }

</bundles_post_ra>
